<compile_context>
chip_gen: v6e
topology: v6e:2x2x1
jax: 0.10.0
libtpu: 0.0.40
codegen_flags: <defaults>
</compile_context>

<pallas_src>
import functools

import jax
import jax.numpy as jnp
from jax.experimental import pallas as pl
from jax.experimental.pallas import tpu as pltpu


def _round_up(x: int, m: int) -> int:
    return ((x + m - 1) // m) * m


def _gaussian_upsampling_kernel(c_ref, t_ref, hs_ref, o_ref, *, denom_col):
    # Blocks seen by the kernel (leading batch-block dim of size 1):
    #   c_ref:  (1, 1, T_text)       f32   sqrt(delta)-scaled centers
    #                                      (masked tokens pushed to a far sentinel)
    #   t_ref:  (1, TF, 1)           f32   sqrt(delta)-scaled masked frame indices
    #   hs_ref: (1, T_text, adim_p)  bf16  hidden states; if denom_col is not
    #                                      None, column `denom_col` is all 1s
    #   o_ref:  (1, TF, adim_p)
    c = c_ref[0]    # (1, T_text)
    t = t_ref[0]    # (TF, 1)
    hs = hs_ref[0]  # (T_text, adim_p)

    # energy = -(t_s - c_s)^2 ; the softmax shift uses the row MIN of the
    # squared distance (== row max of energy), so energy is never materialized.
    diff = t - c                                   # (TF, T_text)
    sq = diff * diff                               # (TF, T_text), >= 0
    m = jnp.min(sq, axis=-1, keepdims=True)        # (TF, 1)
    e = jnp.exp(m - sq)                            # (TF, T_text) in (0, 1]; masked -> 0
    eb = e.astype(hs.dtype)

    # Unnormalized (TF, T_text) @ (T_text, adim_p) on the MXU, bf16 in / f32 acc.
    acc = jnp.dot(eb, hs, preferred_element_type=jnp.float32)   # (TF, adim_p)

    if denom_col is None:
        # adim already lane-aligned: no free padded column -> XLU row sum.
        denom = jnp.sum(e, axis=-1, keepdims=True)               # (TF, 1)
    else:
        # Denominator accumulated on the MXU via the ones column.
        denom = acc[:, denom_col:denom_col + 1]                   # (TF, 1)

    # denom >= 1 (best token's weight is exp(0) == 1), so approx recip is safe.
    out = acc * pl.reciprocal(denom, approx=True)
    o_ref[0] = out.astype(o_ref.dtype)


def gaussian_upsampling(hs, ds, h_masks=None, d_masks=None, delta=0.1, tf_tile=512):
    """JAX/Pallas equivalent of the PyTorch gaussian_upsampling.

    hs:      (B, T_text, adim) float
    ds:      (B, T_text)       float durations
    h_masks: (B, T_feats)      optional (bool/float)
    d_masks: (B, T_text)       optional (bool/float)
    returns: (B, T_feats, adim)
    """
    B, T_text, adim = hs.shape
    out_dtype = hs.dtype
    ds = ds.astype(jnp.float32)
    sqrt_delta = float(delta) ** 0.5

    if h_masks is None:
        # Data-dependent output length; requires concrete ds (outside jit).
        # TODO(synk): no traced-shape equivalent of `ds.sum().int()` under jit.
        T_feats = int(jnp.sum(ds).astype(jnp.int32))
        h_masks_f = None
    else:
        T_feats = h_masks.shape[-1]
        h_masks_f = h_masks.astype(jnp.float32)

    # Gaussian centers, pre-scaled by sqrt(delta).
    c = jnp.cumsum(ds, axis=-1) - ds / 2.0
    c_s = c * sqrt_delta                                           # (B, T_text)

    # Frame positions t = arange * h_mask, pre-scaled by sqrt(delta).
    t_s = jnp.arange(T_feats, dtype=jnp.float32)[None, :] * sqrt_delta
    if h_masks_f is not None:
        t_s = t_s * h_masks_f                                      # (B, T_feats)
    else:
        t_s = jnp.broadcast_to(t_s, (B, T_feats))

    # Fold d_mask into c: push masked centers far away so exp underflows to
    # exactly 0 for them (equivalent to the -inf masked_fill, and they can
    # never win the row min of sq).  Degenerate all-masked rows (NaN in the
    # reference) instead return the mean of hs.
    if d_masks is not None:
        big = jnp.max(jnp.abs(c_s)) + jnp.max(jnp.abs(t_s)) + 1e3
        c_s = jnp.where(d_masks.astype(bool), c_s, -big)

    # --- padding / tiling choices ------------------------------------------
    adim_p = _round_up(max(adim, 128), 128)
    denom_col = adim if adim_p > adim else None

    # bf16 operands for the MXU (f32 accumulation inside the kernel).
    hs_c = hs if hs.dtype == jnp.bfloat16 else hs.astype(jnp.bfloat16)
    if adim_p != adim:
        hs_c = jnp.pad(hs_c, ((0, 0), (0, 0), (0, adim_p - adim)))
        # Reuse the first padded (otherwise wasted) column to accumulate the
        # softmax denominator on the MXU.
        hs_c = hs_c.at[:, :, adim].set(jnp.asarray(1.0, hs_c.dtype))

    out_itemsize = jnp.dtype(out_dtype).itemsize

    def _vmem_estimate(tf_rows):
        hs_blk = 2 * T_text * adim_p * 2                   # bf16, double-buffered
        out_blk = 2 * tf_rows * adim_p * out_itemsize      # double-buffered
        tmp = 4 * tf_rows * T_text * 4                     # diff/sq/e f32 temporaries
        tmp += tf_rows * T_text * 2                        # e in bf16
        tmp += tf_rows * adim_p * 4                        # f32 matmul accumulator
        aux = 2 * (T_text + tf_rows) * 4                   # c / t blocks
        return hs_blk + out_blk + tmp + aux

    # Balanced T_feats tiling: minimizes row padding (<~8 rows per tile) and
    # shrinks the tile if the VMEM estimate gets too large for any chip.
    budget = 24 * 1024 * 1024
    tile = max(8, min(int(tf_tile), _round_up(T_feats, 8)))
    while True:
        n_tiles = -(-T_feats // tile)
        TF = _round_up(-(-T_feats // n_tiles), 8)
        if _vmem_estimate(TF) <= budget or tile <= 64:
            break
        tile //= 2
    T_feats_p = TF * n_tiles

    if T_feats_p != T_feats:
        t_s = jnp.pad(t_s, ((0, 0), (0, T_feats_p - T_feats)))

    # Reshape aux tensors so block last-two dims == full array dims.
    c3 = c_s.reshape(B, 1, T_text)
    t3 = t_s.reshape(B, T_feats_p, 1)

    est = _vmem_estimate(TF)
    vmem_limit = min(48 * 1024 * 1024, max(16 * 1024 * 1024, int(est * 1.5)))

    kernel = functools.partial(_gaussian_upsampling_kernel, denom_col=denom_col)

    out = pl.pallas_call(
        kernel,
        out_shape=jax.ShapeDtypeStruct((B, T_feats_p, adim_p), out_dtype),
        grid_spec=pltpu.PrefetchScalarGridSpec(
            num_scalar_prefetch=0,
            grid=(B, n_tiles),
            in_specs=[
                # batch-indexed only -> VMEM-resident across the f axis
                pl.BlockSpec((1, 1, T_text), lambda b, f: (b, 0, 0)),
                # tiled over T_feats
                pl.BlockSpec((1, TF, 1), lambda b, f: (b, f, 0)),
                # batch-indexed only
                pl.BlockSpec((1, T_text, adim_p), lambda b, f: (b, 0, 0)),
            ],
            out_specs=pl.BlockSpec((1, TF, adim_p), lambda b, f: (b, f, 0)),
        ),
        compiler_params=pltpu.CompilerParams(
            dimension_semantics=("parallel", "parallel"),
            vmem_limit_bytes=vmem_limit,
        ),
    )(c3, t3, hs_c)

    # Strip padding only if any was added (the slice is an extra HBM copy).
    if T_feats_p != T_feats or adim_p != adim:
        out = out[:, :T_feats, :adim]
    return out


class GaussianUpsampling:
    """Gaussian upsampling with fixed temperature (Pallas TPU implementation)."""

    def __init__(self, delta=0.1):
        self.delta = delta  # no learnable parameters in this module

    def __call__(self, hs, ds, h_masks=None, d_masks=None):
        return gaussian_upsampling(hs, ds, h_masks, d_masks, self.delta)


def _reference(hs, ds, h_masks, d_masks, delta):
    """Pure-JAX reference mirroring the PyTorch code for verification."""
    B = ds.shape[0]
    T_feats = h_masks.shape[-1]
    t = jnp.tile(jnp.arange(T_feats, dtype=jnp.float32)[None, :], (B, 1))
    t = t * h_masks.astype(jnp.float32)
    c = jnp.cumsum(ds, axis=-1) - ds / 2.0
    energy = -delta * (t[:, :, None] - c[:, None, :]) ** 2
    energy = jnp.where(d_masks[:, None, :].astype(bool), energy, -jnp.inf)
    p_attn = jax.nn.softmax(energy, axis=2)
    return jnp.matmul(p_attn, hs)


if __name__ == "__main__":
    key = jax.random.PRNGKey(0)
    k1, k2 = jax.random.split(key)

    B, T_text, adim, T_feats = 2, 8, 32, 16

    hs = jax.random.normal(k1, (B, T_text, adim), dtype=jnp.float32)
    # durations in [1, 3], roughly summing near T_feats
    ds = jax.random.uniform(k2, (B, T_text), minval=1.0, maxval=3.0, dtype=jnp.float32)

    # frame mask: first batch full, second batch has trailing padding
    h_masks = jnp.stack([
        jnp.ones((T_feats,), dtype=bool),
        jnp.arange(T_feats) < (T_feats - 4),
    ])
    # token mask: first batch full, second batch has trailing padding
    d_masks = jnp.stack([
        jnp.ones((T_text,), dtype=bool),
        jnp.arange(T_text) < (T_text - 2),
    ])

    model = GaussianUpsampling(delta=0.1)
    out = model(hs, ds, h_masks=h_masks, d_masks=d_masks)
    out = jax.block_until_ready(out)

    ref = _reference(hs, ds, h_masks, d_masks, 0.1)
    assert out.shape == (B, T_feats, adim), out.shape
    # bf16 MXU operands with f32 accumulation -> allow ~1e-2 relative error.
    assert jnp.allclose(out, ref, atol=2e-2, rtol=2e-2), float(jnp.max(jnp.abs(out - ref)))

    print("KERNEL_OK")
</pallas_src>

<mosaic_0001>
module attributes {stable_mosaic.version = 11 : i64} {
  func.func @_gaussian_upsampling_kernel(%arg0: i32, %arg1: i32, %arg2: memref<1x1x8xf32, #tpu.memory_space<vmem>>, %arg3: memref<1x16x1xf32, #tpu.memory_space<vmem>>, %arg4: memref<1x8x128xbf16, #tpu.memory_space<vmem>>, %arg5: memref<1x16x128xf32, #tpu.memory_space<vmem>>) attributes {dimension_semantics = [#tpu.dimension_semantics<parallel>, #tpu.dimension_semantics<parallel>], iteration_bounds = array<i64: 2, 1>, scalar_prefetch = 0 : i64, scratch_operands = 0 : i64, tpu.core_type = #tpu.core_type<tc>, window_params = [{transform_indices = @transform_0, window_bounds = array<i64: 1, 1, 8>}, {transform_indices = @transform_1, window_bounds = array<i64: 1, 16, 1>}, {transform_indices = @transform_2, window_bounds = array<i64: 1, 8, 128>}, {transform_indices = @transform_3, window_bounds = array<i64: 1, 16, 128>}]} {
    %c0 = arith.constant 0 : index
    %c0_0 = arith.constant 0 : index
    %c0_1 = arith.constant 0 : index
    %0 = vector.load %arg2[%c0, %c0_0, %c0_1] : memref<1x1x8xf32, #tpu.memory_space<vmem>>, vector<1x1x8xf32>
    %1 = vector.shape_cast %0 : vector<1x1x8xf32> to vector<1x8xf32>
    %c0_2 = arith.constant 0 : index
    %c0_3 = arith.constant 0 : index
    %c0_4 = arith.constant 0 : index
    %2 = vector.load %arg3[%c0_2, %c0_3, %c0_4] : memref<1x16x1xf32, #tpu.memory_space<vmem>>, vector<1x16x1xf32>
    %3 = vector.shape_cast %2 : vector<1x16x1xf32> to vector<16x1xf32>
    %c0_5 = arith.constant 0 : index
    %c0_6 = arith.constant 0 : index
    %c0_7 = arith.constant 0 : index
    %4 = vector.load %arg4[%c0_5, %c0_6, %c0_7] : memref<1x8x128xbf16, #tpu.memory_space<vmem>>, vector<1x8x128xbf16>
    %5 = vector.shape_cast %4 : vector<1x8x128xbf16> to vector<8x128xbf16>
    %6 = vector.broadcast %3 : vector<16x1xf32> to vector<16x8xf32>
    %7 = vector.broadcast %1 : vector<1x8xf32> to vector<16x8xf32>
    %8 = arith.subf %6, %7 : vector<16x8xf32>
    %9 = arith.mulf %8, %8 : vector<16x8xf32>
    %cst = arith.constant dense<0x7F800000> : vector<16xf32>
    %10 = vector.multi_reduction <minimumf>, %9, %cst [1] : vector<16x8xf32> to vector<16xf32>
    %11 = vector.shape_cast %10 : vector<16xf32> to vector<16x1xf32>
    %12 = vector.broadcast %11 : vector<16x1xf32> to vector<16x8xf32>
    %13 = arith.subf %12, %9 : vector<16x8xf32>
    %14 = math.exp %13 : vector<16x8xf32>
    %15 = arith.truncf %14 : vector<16x8xf32> to vector<16x8xbf16>
    %cst_8 = arith.constant dense<0.000000e+00> : vector<16x128xf32>
    %16 = tpu.matmul %15, %5, %cst_8 {dimension_numbers = #tpu.dot_dimension_numbers<[1], [0], [0], [1], [0, 0, 1, 1], [], []>} : vector<16x8xbf16>, vector<8x128xbf16>, vector<16x128xf32> -> vector<16x128xf32>
    %17 = vector.extract_strided_slice %16 {offsets = [0, 32], sizes = [16, 1], strides = [1, 1]} : vector<16x128xf32> to vector<16x1xf32>
    %18 = tpu.reciprocal %17 {approx = true} : vector<16x1xf32> -> vector<16x1xf32>
    %19 = vector.broadcast %18 : vector<16x1xf32> to vector<16x128xf32>
    %20 = arith.mulf %16, %19 : vector<16x128xf32>
    %c0_9 = arith.constant 0 : index
    %c0_10 = arith.constant 0 : index
    %c0_11 = arith.constant 0 : index
    %21 = vector.load %arg5[%c0_9, %c0_10, %c0_11] : memref<1x16x128xf32, #tpu.memory_space<vmem>>, vector<1x16x128xf32>
    %22 = vector.shape_cast %21 : vector<1x16x128xf32> to vector<16x128xf32>
    %23 = vector.shape_cast %20 : vector<16x128xf32> to vector<1x16x128xf32>
    tpu.vector_store %arg5[%c0_9, %c0_10, %c0_11], %23 {strides = array<i32>} : memref<1x16x128xf32, #tpu.memory_space<vmem>>, vector<1x16x128xf32>,
    return
  }
  func.func @transform_0(%arg0: i32, %arg1: i32) -> (i32, i32, i32) {
    %c0_i32 = arith.constant 0 : i32
    %c0_i32_0 = arith.constant 0 : i32
    %c0_i32_1 = arith.constant 0 : i32
    return %arg0, %c0_i32, %c0_i32_0 : i32, i32, i32
  }
  func.func @transform_1(%arg0: i32, %arg1: i32) -> (i32, i32, i32) {
    %c0_i32 = arith.constant 0 : i32
    %c0_i32_0 = arith.constant 0 : i32
    return %arg0, %arg1, %c0_i32 : i32, i32, i32
  }
  func.func @transform_2(%arg0: i32, %arg1: i32) -> (i32, i32, i32) {
    %c0_i32 = arith.constant 0 : i32
    %c0_i32_0 = arith.constant 0 : i32
    %c0_i32_1 = arith.constant 0 : i32
    return %arg0, %c0_i32, %c0_i32_0 : i32, i32, i32
  }
  func.func @transform_3(%arg0: i32, %arg1: i32) -> (i32, i32, i32) {
    %c0_i32 = arith.constant 0 : i32
    %c0_i32_0 = arith.constant 0 : i32
    return %arg0, %arg1, %c0_i32 : i32, i32, i32
  }
}

</mosaic_0001>

<bundles_post_ra>
// kernel: tpu_custom_call.1
= control target key start
LH: loop header
LB: loop body
LE: loop exit
PB: predicated region body
PF: predicated region fallthrough
CT: control target
= control target key end

     0   :  { %8 = vsyncpa [#allocation3], 0  ;;  %s776_s0 = inlined_call_operand.vmem [shape: f32[2,1,8], index: 0, kind: input, shape index: {}]   ;;  %s777_s1 = inlined_call_operand.vmem [shape: f32[2,16,1], index: 1, kind: input, shape index: {}]   ;;  %s778_s2 = inlined_call_operand.vmem [shape: bf16[2,8,128], index: 2, kind: input, shape index: {}]   ;;  %s779_s3 = inlined_call_operand.hbm [shape: f32[2,16,128], index: 3, kind: output, shape index: {}]  }
   0x1   :  { %10 = vsyncpa [#allocation3 + $0x1], 0  ;;  %s653_s12 = smov 0   ;;  %s655_s13 = smov 0  }
   0x2   :  { %s657_s14 = smov 0   ;;  %s659_s15 = smov 0  }
   0x3   :  { %s661_s16 = smov 0   ;;  %s663_s17 = smov 0  }
   0x4 LB: > { %s450_s18 = sadd.s32 4294967295, %s624_s17   ;;  %s451_s19 = sadd.s32 4294967294, %s624_s17   ;;  %s624_s17 = sphi %s663_s17, %s16_s17   ;;  %s620_s16 = sphi %s661_s16, %s786_s16   ;;  %s616_s15 = sphi %s659_s15, %s785_s15   ;;  %s612_s14 = sphi %s657_s14, %s784_s14   ;;  %s608_s13 = sphi %s655_s13, %s783_s13   ;;  %s604_s12 = sphi %s653_s12, %s782_s12  }
   0x5   : > { %s28_s20 = sadd.s32 1, %s620_s16  ;;  %s117_s21 = sadd.s32 1, %s612_s14 }
   0x6   : > { %p30_p0 = scmp.ge.s32.totalorder %s28_s20, 2  ;;  %p127_p1 = scmp.ne.s32.totalorder %s612_s14, %s608_s13 }
   0x7   : > { %p128_p2 = scmp.eq.s32.totalorder %s450_s18, 1  ;;  %p133_p3 = scmp.ne.s32.totalorder %s608_s13, %s604_s12 }
   0x8   : > { %s788_s20 = smov (%p30_p0, %s28_s20), 0  ;;  %p134_p5 = scmp.eq.s32.totalorder %s451_s19, 1 }
   0x9   : > { %p693_p4 = por %p128_p2, %p127_p1  ;;  %s112_s23 = ssub.s32 %s620_s16, %s788_s20 }
   0xa   : > { %p454_p6 = scmp.ge.s32.totalorder %s624_s17, 1  ;;  %p115_p7 = scmp.eq.s32.totalorder %s112_s23, 0 }
   0xb   : > { %p700_p8 = por %p134_p5, %p133_p3  ;;  %p178_p9 = scmp.lt.s32.totalorder %s624_s17, 3 }
   0xc   : > { %s706_s25 = scalar_select %p115_p7, %s612_s14, %s117_s21  }
   0xd   : > { %p179_p10 = pnand %p454_p6, %p178_p9 }
   0xe   : > { %p213_p11 = scmp.lt.s32.totalorder (!%p179_p10), %s616_s15, 1  ;;  %s210_s11 = sand.u32 (!%p179_p10), 1, %s608_s13  }
   0xf   : > { %182 = sbr.rel (%p179_p10) target bundleno = 667 (0x29b), region = 32  ;;  %s455_s18 = sshll.u32 (!%p179_p10), %s210_s11, 4 }
  0x10   : > { %s212_s19 = scalar_lea.vmem (!%p179_p10), [#allocation2], %s455_s18  ;;  %s467_s23 = sshll.u32 (!%p179_p10), %s616_s15, 8 }
  0x11   : > { %s350_s21 = sshll.u32 (!%p179_p10), %s212_s19, 4  ;;  %s729_s28 = scalar_lea.hbm (!%p179_p10), %s779_s3, %s467_s23  ;;  %s724_s21 = int_to_ptr.vmem [resolvable:$true] %s350_s21 }
  0x12   : > { %s731_s29 = scalar_lea.sflag (!%p179_p10), [#allocation3], %s210_s11 }
  0x14   : > { %v626_v0 = vmov 0   ;;  %s214_s26 = scalar_select %p213_p11, %s616_s15, 1  ;;  %vm256_vm0 = vcmask 64512   ;;  %vm273_vm1 = vcmask 1043456   ;;  %v627_v12 = vmov 0.0  }
  0x15   : > { %537 = vset.pattern.permute.xlu0 %v626_v0  ;;  %470 = vmatprep.subr.bf16.mxu0 %v627_v12  ;;  %vm628_vm2 = vmmov 0   ;;  %v629_v24 = vmov 32   ;;  %s630_s15 = smov [#allocation2]  }
  0x16   : > { %s466_s27 = sshll.u32 %s214_s26, 4  ;;  %s215_s6 = scalar_lea.vmem %s776_s0, %s214_s26  ;;  %472 = vmatprep.mubr.msk.bf16.mxu0 %vm628_vm2, %v627_v12  ;;  %539 = vset.pattern.permute.xlu1 %v629_v24 }
  0x17   : > { %s224_s30 = scalar_lea.vmem %s777_s1, %s466_s27  ;;  %v459_v3 = vld [vmem:[%s215_s6] ss:$0 sm:$0xff]  ;;  %s458_s7 = sshll.u32 %s214_s26, 2 }
  0x18   : > { %v233_v1 = vld [vmem:[%s224_s30] sm:$0xff]  ;;  %v234_v2 = vld [vmem:[%s224_s30 + $0x8] sm:$0xff]  ;;  %s229_s10 = scalar_lea.vmem %s778_s2, %s458_s7  ;;  %s548_s30 = scalar_lea.vmem %s724_s21, 256 }
  0x19   : > { %238 = vperm.xlu0 %537, %v233_v1   ;;  %v235_v13 = vld [vmem:[%s229_s10] sm:$0xf]  ;;  %p549_p12 = scmp.ne.s32.totalorder %s724_s21, %s548_s30  ;;  %s552_s4 = sshll.u32 %s630_s15, 4  ;;  %s553_s4 = int_to_ptr.vmem [resolvable:$false] %s552_s4 }
  0x1a   : > { %v275_v14 = vsel %vm273_vm1, %v235_v13, 0  ;;  %s554_s5 = scalar_lea.vmem %s553_s4, 512  ;;  %p555_p1 = scmp.lt.s32.totalorder %s724_s21, %s553_s4 }
  0x1b   : > { %471 = vmatpush3.bf16.msra.mxu0 %v275_v14  ;;  %p550_p13 = pnand %p549_p12, %p693_p4  ;;  %p556_p2 = scmp.lt.s32.totalorder %s554_s5, %s548_s30 }
  0x1d   : > { %243 = vperm.xlu0 %537, %v234_v2   ;;  %p551_p0 = pneg %p550_p13  ;;  %p557_p3 = por %p556_p2, %p555_p1 }
  0x1f   : > { %p558_p5 = pnand %p557_p3, %p551_p0 }
  0x21   : > { %538 = vset.pattern.permute.xlu0 %v629_v24 }
  0x94   : > { %v239_v4 = vpop.permute.xlu0 %238 }
  0x95   : > { %v252_v5 = vsub.f32 %v239_v4, %v459_v3 }
  0x97   : > { %v254_v6 = vmul.f32 %v252_v5, %v252_v5 }
  0x98   : > { %v244_v7 = vpop.permute.xlu0 %243 }
  0x99   : > { %v253_v8 = vsub.f32 %v244_v7, %v459_v3  ;;  %v257_v9 = vsel %vm256_vm0, %v254_v6, inf }
  0x9a   : > { %258 = vmin.xlane.f32.xlu1 %v257_v9 }
  0x9b   : > { %v255_v10 = vmul.f32 %v253_v8, %v253_v8 }
  0x9d   : > { %v260_v11 = vsel %vm256_vm0, %v255_v10, inf }
  0x9e   : > { %261 = vmin.xlane.f32.xlu1 %v260_v11 }
 0x123   : > { %v259_v15 = vpop.xlane.xlu1 %258 }
 0x124   : > { %v263_v16 = vsub.f32 %v259_v15, %v254_v6 }
 0x126   : > { %v265_v17 = vmul.f32 1.442695, %v263_v16 }
 0x127   : > { %v262_v18 = vpop.xlane.xlu1 %261 }
 0x128   : > { %v264_v19 = vsub.f32 %v262_v18, %v255_v10  ;;  %540 = vpow2.f32 %v265_v17 }
 0x12a   : > { %v267_v20 = vmul.f32 1.442695, %v264_v19 }
 0x12c   : > { %542 = vpow2.f32 %v267_v20 }
 0x135   : > { %v541_v21 = vpop.eup %540 }
 0x139   : > { %v543_v22 = vpop.eup %542 }
 0x13a   : > { %v269_v23 = vpack.c.bf16 %v543_v22, %v541_v21 }
 0x13c   : > { %473 = vmatmul.mubr.msk.bf16.vlgmr.msra.gmra.mxu0 %vm256_vm0, %v269_v23 }
 0x1fc   : > { %v311_v25 = vpop.f32.mrf.mxu0 }
 0x1fd   : > { %544 = vrcp.f32 %v311_v25 }
 0x1fe   : > { %v474_v26 = vpop.f32.mrf.mxu0 }
 0x200   : > { %v314_v27 = vpop.f32.mrf.mxu0 }
 0x201   : > { %546 = vrcp.f32 %v314_v27 }
 0x202   : > { %v475_v28 = vpop.f32.mrf.mxu0 }
 0x20a   : > { %v545_v29 = vpop.eup %544 }
 0x20b   : > { %322 = vperm.xlu0 %538, %v545_v29  }
 0x20e   : > { %v547_v30 = vpop.eup %546 }
 0x20f   : > { %327 = vperm.xlu1 %539, %v547_v30  }
 0x286   : > { %v323_v31 = vpop.permute.xlu0 %322 }
 0x287   : > { %v330_v32 = vmul.f32 %v323_v31, %v311_v25 }
 0x289   : > { %332 = vst [vmem:[%s212_s19] sm:$0xff] %v330_v32 }
 0x28a   : > { %v328_v33 = vpop.permute.xlu1 %327 }
 0x28b   : > { %v331_v34 = vmul.f32 %v328_v33, %v314_v27 }
 0x28d   : > { %333 = vst [vmem:[%s212_s19 + $0x8] sm:$0xff] %v331_v34 }
 0x28e   : > { %561 = shalt.err (!%p558_p5)
}
 0x28f   : > { %s562_s6 = scalar_lea.hbm %s729_s28, 256  ;;  %s566_s9 = scalar_lea.hbm %s779_s3, 512 }
 0x290   : > { %p563_p6 = scmp.ne.s32.totalorder %s729_s28, %s562_s6  ;;  %p567_p10 = scmp.lt.s32.totalorder %s729_s28, %s779_s3 }
 0x291   : > { %p568_p11 = scmp.lt.s32.totalorder %s566_s9, %s562_s6 }
 0x292   : > { %p564_p7 = pnand %p563_p6, %p693_p4 }
 0x293   : > { %p569_p12 = por %p568_p11, %p567_p10 }
 0x294   : > { %p565_p9 = pneg %p564_p7 }
 0x296   : > { %p570_p13 = pnand %p569_p12, %p565_p9 }
 0x298   : > { %573 = shalt.err (!%p570_p13)
}
 0x299   : > { %s631_s18 = smov 128   ;;  %s632_s19 = smov 8  }
 0x29a   : > { %476 = dma.vmem_to_hbm [thread:$0]  (%p693_p4), %s724_s21, 256, %s729_s28, %s731_s29, %s631_s18, %s631_s18, %s632_s19  }
 0x29b PF: > { %p482_p0 = scmp.ge.s32.totalorder %s624_s17, 2  ;;  %s365_s23 = sand.u32 1, %s604_s12  }
 0x29c   : > { %s366_s26 = scalar_lea.sflag [#allocation3], %s365_s23 }
 0x29d   : > { %p479_p1 = pnand %p482_p0, %p700_p8 }
 0x29f   : > { %p480_p2 = pneg %p479_p1 }
 0x2a1   : > { %599 = dma.done.wait (%p480_p2), %s366_s26, 256  }
 0x2a2   : > { %601 = vsyncadd (%p480_p2), %s366_s26, 4294967040  ;;  %s16_s17 = sadd.s32 1, %s624_s17   ;;  %s782_s12 = smov %s608_s13 }
 0x2a3   : > { %p13_p3 = scmp.ge.s32.totalorder %s16_s17, 4   ;;  %s783_s13 = smov %s612_s14 }
 0x2a4   : > { %s784_s14 = smov %s706_s25  ;;  %s785_s15 = smov %s620_s16 }
 0x2a5   : > { %s786_s16 = smov %s788_s20  ;;  %15 = sbr.rel (!%p13_p3) target bundleno = 4 (0x4), region = 73 }
 0x2aa   :  { %371 = vsyncpa [#allocation3], 1 }
 0x2ab   :  { %373 = vsyncpa [#allocation3 + $0x1], 1 }

</bundles_post_ra>
